<compile_context>
chip_gen: v6e
topology: v6e:2x2x1
jax: 0.10.0
libtpu: 0.0.40
codegen_flags: <defaults>
</compile_context>

<pallas_src>
import functools

import jax
import jax.numpy as jnp
from jax.experimental import pallas as pl
from jax.experimental.pallas import tpu as pltpu


def _full4net_kernel(xT_ref,
                     w1_ref, b1_ref,
                     w2_ref, b2_ref,
                     w3_ref, b3_ref,
                     w4_ref, b4_ref,
                     o_ref):
    xT = xT_ref[...]                 # [2, TB]   f32, batch on lanes
    w1 = w1_ref[...]                 # [hid, 2]  f32 (PyTorch (out, in) layout)

    # Layer 1: Linear(2, hid) + tanh  — K=2, so pure VPU broadcast FMA.
    h1 = jnp.tanh(w1[:, 0:1] * xT[0:1, :]
                  + w1[:, 1:2] * xT[1:2, :]
                  + b1_ref[...])                                   # [hid, TB]

    # Layers 2-3: Linear(hid, hid) + tanh — MXU, f32 accumulation.
    mm_dtype = w2_ref.dtype
    h2 = jnp.tanh(
        jnp.dot(w2_ref[...], h1.astype(mm_dtype),
                preferred_element_type=jnp.float32) + b2_ref[...])  # [hid, TB]
    h3 = jnp.tanh(
        jnp.dot(w3_ref[...], h2.astype(mm_dtype),
                preferred_element_type=jnp.float32) + b3_ref[...])  # [hid, TB]

    # Layer 4: Linear(hid, 1) + sigmoid — N=1, so VPU multiply + sublane
    # reduce (XLU) producing a lane-dense [1, TB] row.
    z = jnp.sum(h3 * w4_ref[...], axis=0, keepdims=True) + b4_ref[...]
    o_ref[...] = jax.nn.sigmoid(z).astype(o_ref.dtype)


def prepare_params(params, *, mxu_dtype=jnp.float32):
    """One-time layout prep (call once, outside the forward path).

    Consumes PyTorch-convention params (w_i: [out, in], b_i: [out]) and emits
    kernel-layout params. Weights are NOT transposed per call; biases become
    [out, 1] columns, w4 becomes a [hid, 1] column. w2/w3 may be cast to bf16
    for the MXU (accumulation stays f32); VPU-path tensors stay f32.
    """
    hid = params["w2"].shape[0]
    f32 = jnp.float32
    return {
        "w1": params["w1"].astype(f32),                      # [hid, 2]
        "b1": params["b1"].reshape(hid, 1).astype(f32),      # [hid, 1]
        "w2": params["w2"].astype(mxu_dtype),                # [hid, hid]
        "b2": params["b2"].reshape(hid, 1).astype(f32),
        "w3": params["w3"].astype(mxu_dtype),                # [hid, hid]
        "b3": params["b3"].reshape(hid, 1).astype(f32),
        "w4": params["w4"].reshape(hid, 1).astype(f32),      # [hid, 1]
        "b4": params["b4"].reshape(1, 1).astype(f32),        # [1, 1]
    }


@functools.partial(jax.jit, static_argnames=("tb",))
def full4net_forward(x, prep, *, tb=512):
    """x: [B, 2] float32.  prep: output of prepare_params().  Returns [B, 1]."""
    B = x.shape[0]
    hid = prep["w2"].shape[0]

    # Batch tiling: lane dim must be a multiple of 128 (or the full extent).
    if B <= tb:
        TB = pl.cdiv(B, 128) * 128
        B_pad = TB
    else:
        TB = tb
        B_pad = pl.cdiv(B, TB) * TB
    grid = (B_pad // TB,)

    # Batch-on-lanes input slab [2, B_pad] (x itself is tiny: 2*B floats).
    xT = jnp.zeros((2, B_pad), jnp.float32).at[:, :B].set(
        x.astype(jnp.float32).T)

    in_specs = [
        pl.BlockSpec((2, TB), lambda i: (0, i)),        # xT  : batch-tiled
        pl.BlockSpec((hid, 2), lambda i: (0, 0)),       # w1  : VMEM-resident
        pl.BlockSpec((hid, 1), lambda i: (0, 0)),       # b1
        pl.BlockSpec((hid, hid), lambda i: (0, 0)),     # w2
        pl.BlockSpec((hid, 1), lambda i: (0, 0)),       # b2
        pl.BlockSpec((hid, hid), lambda i: (0, 0)),     # w3
        pl.BlockSpec((hid, 1), lambda i: (0, 0)),       # b3
        pl.BlockSpec((hid, 1), lambda i: (0, 0)),       # w4
        pl.BlockSpec((1, 1), lambda i: (0, 0)),         # b4
    ]

    outT = pl.pallas_call(
        _full4net_kernel,
        out_shape=jax.ShapeDtypeStruct((1, B_pad), jnp.float32),
        grid=grid,
        in_specs=in_specs,
        out_specs=pl.BlockSpec((1, TB), lambda i: (0, i)),  # lane-dense store
        compiler_params=pltpu.CompilerParams(
            dimension_semantics=("parallel",)),             # megacore on v7x
    )(xT, prep["w1"], prep["b1"], prep["w2"], prep["b2"],
      prep["w3"], prep["b3"], prep["w4"], prep["b4"])

    return outT[0, :B].reshape(B, 1)


def init_params(hid, key):
    """Deterministic parameter init matching Full4Net(hid) shapes (PyTorch conv.)."""
    ks = jax.random.split(key, 8)

    def lin(kw, kb, fan_in, fan_out):
        bound = 1.0 / jnp.sqrt(fan_in)
        w = jax.random.uniform(kw, (fan_out, fan_in), jnp.float32, -bound, bound)
        b = jax.random.uniform(kb, (fan_out,), jnp.float32, -bound, bound)
        return w, b

    w1, b1 = lin(ks[0], ks[1], 2, hid)
    w2, b2 = lin(ks[2], ks[3], hid, hid)
    w3, b3 = lin(ks[4], ks[5], hid, hid)
    w4, b4 = lin(ks[6], ks[7], hid, 1)
    return {"w1": w1, "b1": b1, "w2": w2, "b2": b2,
            "w3": w3, "b3": b3, "w4": w4, "b4": b4}


def reference_forward(x, p):
    h1 = jnp.tanh(x @ p["w1"].T + p["b1"])
    h2 = jnp.tanh(h1 @ p["w2"].T + p["b2"])
    h3 = jnp.tanh(h2 @ p["w3"].T + p["b3"])
    return jax.nn.sigmoid(h3 @ p["w4"].T + p["b4"])


if __name__ == "__main__":
    key = jax.random.PRNGKey(0)
    k_x, k_p = jax.random.split(key)

    batch, hid = 8, 32
    x = jax.random.normal(k_x, (batch, 2), jnp.float32)
    params = init_params(hid, k_p)

    # One-time layout prep (no per-call weight transposes). Pass
    # mxu_dtype=jnp.bfloat16 on v5e/v6e/v7x when compute/BW-bound; kept f32
    # here so the tight numerical check against the f32 reference holds.
    prep = prepare_params(params, mxu_dtype=jnp.float32)

    out = jax.block_until_ready(full4net_forward(x, prep))

    ref = reference_forward(x, params)
    assert out.shape == (batch, 1)
    assert jnp.allclose(out, ref, atol=1e-5, rtol=1e-5), "mismatch vs reference"

    print("KERNEL_OK")
</pallas_src>

<mosaic_0001>
module attributes {stable_mosaic.version = 11 : i64} {
  func.func @_full4net_kernel(%arg0: i32, %arg1: memref<2x128xf32, #tpu.memory_space<vmem>>, %arg2: memref<32x2xf32, #tpu.memory_space<vmem>>, %arg3: memref<32x1xf32, #tpu.memory_space<vmem>>, %arg4: memref<32x32xf32, #tpu.memory_space<vmem>>, %arg5: memref<32x1xf32, #tpu.memory_space<vmem>>, %arg6: memref<32x32xf32, #tpu.memory_space<vmem>>, %arg7: memref<32x1xf32, #tpu.memory_space<vmem>>, %arg8: memref<32x1xf32, #tpu.memory_space<vmem>>, %arg9: memref<1x1xf32, #tpu.memory_space<vmem>>, %arg10: memref<1x128xf32, #tpu.memory_space<vmem>>) attributes {dimension_semantics = [#tpu.dimension_semantics<parallel>], iteration_bounds = array<i64: 1>, scalar_prefetch = 0 : i64, scratch_operands = 0 : i64, tpu.core_type = #tpu.core_type<tc>, window_params = [{transform_indices = @transform_0, window_bounds = array<i64: 2, 128>}, {pipeline_mode = #tpu.pipeline_mode<synchronous>, transform_indices = @transform_1, window_bounds = array<i64: 32, 2>}, {pipeline_mode = #tpu.pipeline_mode<synchronous>, transform_indices = @transform_2, window_bounds = array<i64: 32, 1>}, {pipeline_mode = #tpu.pipeline_mode<synchronous>, transform_indices = @transform_3, window_bounds = array<i64: 32, 32>}, {pipeline_mode = #tpu.pipeline_mode<synchronous>, transform_indices = @transform_4, window_bounds = array<i64: 32, 1>}, {pipeline_mode = #tpu.pipeline_mode<synchronous>, transform_indices = @transform_5, window_bounds = array<i64: 32, 32>}, {pipeline_mode = #tpu.pipeline_mode<synchronous>, transform_indices = @transform_6, window_bounds = array<i64: 32, 1>}, {pipeline_mode = #tpu.pipeline_mode<synchronous>, transform_indices = @transform_7, window_bounds = array<i64: 32, 1>}, {pipeline_mode = #tpu.pipeline_mode<synchronous>, transform_indices = @transform_8, window_bounds = array<i64: 1, 1>}, {transform_indices = @transform_9, window_bounds = array<i64: 1, 128>}]} {
    %c0 = arith.constant 0 : index
    %c0_0 = arith.constant 0 : index
    %0 = vector.load %arg1[%c0, %c0_0] : memref<2x128xf32, #tpu.memory_space<vmem>>, vector<2x128xf32>
    %c0_1 = arith.constant 0 : index
    %c0_2 = arith.constant 0 : index
    %1 = vector.load %arg2[%c0_1, %c0_2] : memref<32x2xf32, #tpu.memory_space<vmem>>, vector<32x2xf32>
    %2 = vector.extract_strided_slice %1 {offsets = [0, 0], sizes = [32, 1], strides = [1, 1]} : vector<32x2xf32> to vector<32x1xf32>
    %3 = vector.extract_strided_slice %0 {offsets = [0, 0], sizes = [1, 128], strides = [1, 1]} : vector<2x128xf32> to vector<1x128xf32>
    %4 = vector.broadcast %2 : vector<32x1xf32> to vector<32x128xf32>
    %5 = vector.broadcast %3 : vector<1x128xf32> to vector<32x128xf32>
    %6 = arith.mulf %4, %5 : vector<32x128xf32>
    %7 = vector.extract_strided_slice %1 {offsets = [0, 1], sizes = [32, 1], strides = [1, 1]} : vector<32x2xf32> to vector<32x1xf32>
    %8 = vector.extract_strided_slice %0 {offsets = [1, 0], sizes = [1, 128], strides = [1, 1]} : vector<2x128xf32> to vector<1x128xf32>
    %9 = vector.broadcast %7 : vector<32x1xf32> to vector<32x128xf32>
    %10 = vector.broadcast %8 : vector<1x128xf32> to vector<32x128xf32>
    %11 = arith.mulf %9, %10 : vector<32x128xf32>
    %12 = arith.addf %6, %11 : vector<32x128xf32>
    %c0_3 = arith.constant 0 : index
    %c0_4 = arith.constant 0 : index
    %13 = vector.load %arg3[%c0_3, %c0_4] : memref<32x1xf32, #tpu.memory_space<vmem>>, vector<32x1xf32>
    %14 = vector.broadcast %13 : vector<32x1xf32> to vector<32x128xf32>
    %15 = arith.addf %12, %14 : vector<32x128xf32>
    %16 = math.tanh %15 : vector<32x128xf32>
    %c0_5 = arith.constant 0 : index
    %c0_6 = arith.constant 0 : index
    %17 = vector.load %arg4[%c0_5, %c0_6] : memref<32x32xf32, #tpu.memory_space<vmem>>, vector<32x32xf32>
    %cst = arith.constant dense<0.000000e+00> : vector<32x128xf32>
    %18 = tpu.matmul %17, %16, %cst {dimension_numbers = #tpu.dot_dimension_numbers<[1], [0], [0], [1], [0, 0, 1, 1], [], []>} : vector<32x32xf32>, vector<32x128xf32>, vector<32x128xf32> -> vector<32x128xf32>
    %c0_7 = arith.constant 0 : index
    %c0_8 = arith.constant 0 : index
    %19 = vector.load %arg5[%c0_7, %c0_8] : memref<32x1xf32, #tpu.memory_space<vmem>>, vector<32x1xf32>
    %20 = vector.broadcast %19 : vector<32x1xf32> to vector<32x128xf32>
    %21 = arith.addf %18, %20 : vector<32x128xf32>
    %22 = math.tanh %21 : vector<32x128xf32>
    %c0_9 = arith.constant 0 : index
    %c0_10 = arith.constant 0 : index
    %23 = vector.load %arg6[%c0_9, %c0_10] : memref<32x32xf32, #tpu.memory_space<vmem>>, vector<32x32xf32>
    %cst_11 = arith.constant dense<0.000000e+00> : vector<32x128xf32>
    %24 = tpu.matmul %23, %22, %cst_11 {dimension_numbers = #tpu.dot_dimension_numbers<[1], [0], [0], [1], [0, 0, 1, 1], [], []>} : vector<32x32xf32>, vector<32x128xf32>, vector<32x128xf32> -> vector<32x128xf32>
    %c0_12 = arith.constant 0 : index
    %c0_13 = arith.constant 0 : index
    %25 = vector.load %arg7[%c0_12, %c0_13] : memref<32x1xf32, #tpu.memory_space<vmem>>, vector<32x1xf32>
    %26 = vector.broadcast %25 : vector<32x1xf32> to vector<32x128xf32>
    %27 = arith.addf %24, %26 : vector<32x128xf32>
    %28 = math.tanh %27 : vector<32x128xf32>
    %c0_14 = arith.constant 0 : index
    %c0_15 = arith.constant 0 : index
    %29 = vector.load %arg8[%c0_14, %c0_15] : memref<32x1xf32, #tpu.memory_space<vmem>>, vector<32x1xf32>
    %30 = vector.broadcast %29 : vector<32x1xf32> to vector<32x128xf32>
    %31 = arith.mulf %28, %30 : vector<32x128xf32>
    %cst_16 = arith.constant dense<0.000000e+00> : vector<128xf32>
    %32 = vector.multi_reduction <add>, %31, %cst_16 [0] : vector<32x128xf32> to vector<128xf32>
    %33 = vector.shape_cast %32 : vector<128xf32> to vector<1x128xf32>
    %c0_17 = arith.constant 0 : index
    %c0_18 = arith.constant 0 : index
    %34 = vector.load %arg9[%c0_17, %c0_18] : memref<1x1xf32, #tpu.memory_space<vmem>>, vector<1x1xf32>
    %35 = vector.broadcast %34 : vector<1x1xf32> to vector<1x128xf32>
    %36 = arith.addf %33, %35 : vector<1x128xf32>
    %37 = arith.negf %36 : vector<1x128xf32>
    %38 = math.exp %37 : vector<1x128xf32>
    %cst_19 = arith.constant 1.000000e+00 : f32
    %39 = vector.broadcast %cst_19 : f32 to vector<1x128xf32>
    %40 = arith.addf %39, %38 : vector<1x128xf32>
    %41 = arith.divf %39, %40 : vector<1x128xf32>
    %c0_20 = arith.constant 0 : index
    %c0_21 = arith.constant 0 : index
    %42 = vector.load %arg10[%c0_20, %c0_21] : memref<1x128xf32, #tpu.memory_space<vmem>>, vector<1x128xf32>
    tpu.vector_store %arg10[%c0_20, %c0_21], %41 {strides = array<i32>} : memref<1x128xf32, #tpu.memory_space<vmem>>, vector<1x128xf32>,
    return
  }
  func.func @transform_0(%arg0: i32) -> (i32, i32) {
    %c0_i32 = arith.constant 0 : i32
    %c0_i32_0 = arith.constant 0 : i32
    return %c0_i32, %arg0 : i32, i32
  }
  func.func @transform_1(%arg0: i32) -> (i32, i32) {
    %c0_i32 = arith.constant 0 : i32
    %c0_i32_0 = arith.constant 0 : i32
    %c0_i32_1 = arith.constant 0 : i32
    return %c0_i32, %c0_i32_0 : i32, i32
  }
  func.func @transform_2(%arg0: i32) -> (i32, i32) {
    %c0_i32 = arith.constant 0 : i32
    %c0_i32_0 = arith.constant 0 : i32
    %c0_i32_1 = arith.constant 0 : i32
    return %c0_i32, %c0_i32_0 : i32, i32
  }
  func.func @transform_3(%arg0: i32) -> (i32, i32) {
    %c0_i32 = arith.constant 0 : i32
    %c0_i32_0 = arith.constant 0 : i32
    %c0_i32_1 = arith.constant 0 : i32
    return %c0_i32, %c0_i32_0 : i32, i32
  }
  func.func @transform_4(%arg0: i32) -> (i32, i32) {
    %c0_i32 = arith.constant 0 : i32
    %c0_i32_0 = arith.constant 0 : i32
    %c0_i32_1 = arith.constant 0 : i32
    return %c0_i32, %c0_i32_0 : i32, i32
  }
  func.func @transform_5(%arg0: i32) -> (i32, i32) {
    %c0_i32 = arith.constant 0 : i32
    %c0_i32_0 = arith.constant 0 : i32
    %c0_i32_1 = arith.constant 0 : i32
    return %c0_i32, %c0_i32_0 : i32, i32
  }
  func.func @transform_6(%arg0: i32) -> (i32, i32) {
    %c0_i32 = arith.constant 0 : i32
    %c0_i32_0 = arith.constant 0 : i32
    %c0_i32_1 = arith.constant 0 : i32
    return %c0_i32, %c0_i32_0 : i32, i32
  }
  func.func @transform_7(%arg0: i32) -> (i32, i32) {
    %c0_i32 = arith.constant 0 : i32
    %c0_i32_0 = arith.constant 0 : i32
    %c0_i32_1 = arith.constant 0 : i32
    return %c0_i32, %c0_i32_0 : i32, i32
  }
  func.func @transform_8(%arg0: i32) -> (i32, i32) {
    %c0_i32 = arith.constant 0 : i32
    %c0_i32_0 = arith.constant 0 : i32
    %c0_i32_1 = arith.constant 0 : i32
    return %c0_i32, %c0_i32_0 : i32, i32
  }
  func.func @transform_9(%arg0: i32) -> (i32, i32) {
    %c0_i32 = arith.constant 0 : i32
    %c0_i32_0 = arith.constant 0 : i32
    return %c0_i32, %arg0 : i32, i32
  }
}

</mosaic_0001>

<bundles_post_ra>
// kernel: full4net_forward.1
= control target key start
LH: loop header
LB: loop body
LE: loop exit
PB: predicated region body
PF: predicated region fallthrough
CT: control target
= control target key end

     0   :  { %v535_v0 = vmov 1   ;;  %v536_v1 = vmov 0   ;;  %vm155_vm0 = vcmask 261120   ;;  %v59_v25 = vlaneseq  ;;  %s696_s1 = inlined_call_operand.vmem [shape: f32[32,2], index: 1, kind: input, shape index: {}]   ;;  %s697_s8 = inlined_call_operand.<no memory space> [shape: f32[1,1], index: 8, kind: input, shape index: {}]   ;;  %s698_s2 = inlined_call_operand.vmem [shape: f32[32,1], index: 2, kind: input, shape index: {}]   ;;  %s699_s4 = inlined_call_operand.vmem [shape: f32[32,1], index: 4, kind: input, shape index: {}]   ;;  %s700_s6 = inlined_call_operand.vmem [shape: f32[32,1], index: 6, kind: input, shape index: {}]   ;;  %s701_s7 = inlined_call_operand.vmem [shape: f32[32,1], index: 7, kind: input, shape index: {}]   ;;  %s702_s3 = inlined_call_operand.vmem [shape: f32[32,32], index: 3, kind: input, shape index: {}]   ;;  %s703_s0 = inlined_call_operand.vmem [shape: f32[2,128], index: 0, kind: input, shape index: {}]   ;;  %s704_s5 = inlined_call_operand.vmem [shape: f32[32,32], index: 5, kind: input, shape index: {}]   ;;  %s705_s9 = inlined_call_operand.vmem [shape: f32[1,128], index: 9, kind: output, shape index: {}]  }
   0x1   :  { %500 = vset.pattern.permute.xlu0 %v535_v0  ;;  %501 = vset.pattern.permute.xlu1 %v536_v1  ;;  %v38_v2 = vld [vmem:[%s696_s1 + $0x18] sm:$0xff]  ;;  %v37_v3 = vld [vmem:[%s696_s1 + $0x10] sm:$0xff]  ;;  %v14_v4 = vstv %s697_s8  ;;  %v36_v5 = vld [vmem:[%s696_s1 + $0x8] sm:$0xff] }
   0x2   :  { %80 = vperm.xlu0 %500, %v38_v2   ;;  %51 = vperm.xlu1 %501, %v37_v3   ;;  %15 = vst [vmem:[#allocation2] sm:$0x1] %v14_v4  ;;  %v35_v6 = vld [vmem:[%s696_s1] sm:$0xff]  ;;  %v98_v7 = vld [vmem:[%s698_s2 + $0x18] sm:$0xff]  ;;  %v96_v8 = vld [vmem:[%s698_s2 + $0x8] sm:$0xff]  ;;  %v654_v26 = vshrl.u32 %v59_v25, 7 }
   0x3   :  { %v134_v9 = vld [vmem:[%s699_s4 + $0x18] sm:$0xff]  ;;  %v97_v10 = vld [vmem:[%s698_s2 + $0x10] sm:$0xff]  ;;  %v132_v11 = vld [vmem:[%s699_s4 + $0x8] sm:$0xff] }
   0x4   :  { %v95_v12 = vld [vmem:[%s698_s2] sm:$0xff]  ;;  %v133_v14 = vld [vmem:[%s699_s4 + $0x10] sm:$0xff]  ;;  %v262_v18 = vld [vmem:[%s700_s6 + $0x8] sm:$0xff]  ;;  %v85_v29 = vsub.s32 1, %v654_v26  ;;  %v61_v30 = vsub.s32 0, %v654_v26 }
   0x5   :  { %v261_v13 = vld [vmem:[%s700_s6] sm:$0xff]  ;;  %v263_v15 = vld [vmem:[%s700_s6 + $0x10] sm:$0xff]  ;;  %v264_v21 = vld [vmem:[%s700_s6 + $0x18] sm:$0xff] }
   0x6   :  { %502 = vset.pattern.permute.xlu1 %v535_v0  ;;  %72 = vperm.xlu0 %500, %v36_v5   ;;  %v131_v16 = vld [vmem:[%s699_s4] sm:$0xff]  ;;  %v388_v19 = vld [vmem:[%s701_s7 + $0x10] sm:$0xff]  ;;  %v387_v23 = vld [vmem:[%s701_s7 + $0x8] sm:$0xff] }
   0x7   :  { %76 = vperm.xlu1 %502, %v37_v3   ;;  %v386_v17 = vld [vmem:[%s701_s7] sm:$0xff]  ;;  %v389_v24 = vld [vmem:[%s701_s7 + $0x18] sm:$0xff] }
   0x8   :  { %v127_v20 = vld [vmem:[%s702_s3] sm:$0xff] }
   0x9   :  { %478 = vmatprep.mubr.msk.f32.mxu0 %vm155_vm0, %v127_v20  ;;  %v423_v22 = vld [vmem:[#allocation2] sm:$0x1]  ;;  %v258_v20 = vld [vmem:[%s704_s5 + $0x8] sm:$0xff] }
   0xa   :  { %504 = vset.pattern.permute.xlu0 %v536_v1  ;;  %v34_v32 = vld [vmem:[%s703_s0] sm:$0x3] }
   0xb   :  { %503 = vset.pattern.permute.xlu1 %v536_v1  ;;  %56 = vperm.xlu0 %504, %v38_v2   ;;  %v86_v34 = vrot.slane %v34_v32, %v85_v29  ;;  %v62_v35 = vrot.slane %v34_v32, %v61_v30  ;;  %v130_v2 = vld [vmem:[%s702_s3 + $0x18] sm:$0xff]  ;;  %v257_v3 = vld [vmem:[%s704_s5] sm:$0xff] }
   0xc   :  { %46 = vperm.xlu1 %503, %v36_v5   ;;  %492 = vmatprep.mubr.msk.f32.mxu1 %vm155_vm0, %v257_v3 }
   0xf   :  { %41 = vperm.xlu0 %504, %v35_v6  }
  0x10   :  { %116 = vperm.xlu1 %503, %v98_v7  }
  0x13   :  { %106 = vperm.xlu0 %504, %v96_v8  }
  0x14   :  { %505 = vset.pattern.permute.xlu1 %v535_v0  ;;  %v128_v0 = vld [vmem:[%s702_s3 + $0x8] sm:$0xff] }
  0x15   :  { %68 = vperm.xlu1 %505, %v35_v6  }
  0x17   :  { %152 = vperm.xlu0 %504, %v134_v9  }
  0x19   :  { %506 = vset.pattern.permute.xlu1 %v536_v1  ;;  %v129_v1 = vld [vmem:[%s702_s3 + $0x10] sm:$0xff] }
  0x1a   :  { %111 = vperm.xlu1 %506, %v97_v10  }
  0x1b   :  { %142 = vperm.xlu0 %504, %v132_v11  }
  0x1e   :  { %101 = vperm.xlu1 %506, %v95_v12  }
  0x1f   :  { %267 = vperm.xlu0 %504, %v261_v13  }
  0x22   :  { %147 = vperm.xlu1 %506, %v133_v14  }
  0x23   :  { %277 = vperm.xlu0 %504, %v263_v15  }
  0x26   :  { %137 = vperm.xlu1 %506, %v131_v16  }
  0x27   :  { %392 = vperm.xlu0 %504, %v386_v17  }
  0x2a   :  { %272 = vperm.xlu1 %506, %v262_v18  }
  0x2b   :  { %402 = vperm.xlu0 %504, %v388_v19  }
  0x2e   :  { %282 = vperm.xlu1 %506, %v264_v21   ;;  %v259_v21 = vld [vmem:[%s704_s5 + $0x10] sm:$0xff] }
  0x2f   :  { %426 = vperm.xlu0 %504, %v423_v22   ;;  %v260_v22 = vld [vmem:[%s704_s5 + $0x18] sm:$0xff] }
  0x32   :  { %397 = vperm.xlu1 %506, %v387_v23  }
  0x36   :  { %407 = vperm.xlu1 %506, %v389_v24  }
  0x7d   :  { %v52_v27 = vpop.permute.xlu1 %51  ;;  %v81_v28 = vpop.permute.xlu0 %80 }
  0x7e   :  { %v90_v36 = vmul.f32 %v86_v34, %v81_v28  ;;  %v65_v48 = vmul.f32 %v62_v35, %v52_v27 }
  0x81   :  { %v73_v31 = vpop.permute.xlu0 %72 }
  0x82   :  { %v77_v33 = vpop.permute.xlu1 %76  ;;  %v88_v45 = vmul.f32 %v86_v34, %v73_v31 }
  0x83   :  { %v89_v44 = vmul.f32 %v86_v34, %v77_v33 }
  0x85   :  { %v93_v53 = vadd.f32 %v89_v44, %v65_v48 }
  0x86   :  { %v57_v37 = vpop.permute.xlu0 %56 }
  0x87   :  { %v66_v38 = vmul.f32 %v62_v35, %v57_v37  ;;  %v47_v39 = vpop.permute.xlu1 %46 }
  0x88   :  { %v64_v46 = vmul.f32 %v62_v35, %v47_v39 }
  0x89   :  { %v94_v40 = vadd.f32 %v90_v36, %v66_v38 }
  0x8a   :  { %v42_v43 = vpop.permute.xlu0 %41  ;;  %v92_v51 = vadd.f32 %v88_v45, %v64_v46 }
  0x8b   :  { %v117_v41 = vpop.permute.xlu1 %116  ;;  %v63_v50 = vmul.f32 %v62_v35, %v42_v43 }
  0x8c   :  { %v122_v42 = vadd.f32 %v117_v41, %v94_v40 }
  0x8e   :  { %507 = vtanh.f32 %v122_v42  ;;  %v107_v49 = vpop.permute.xlu0 %106 }
  0x8f   :  { %v120_v55 = vadd.f32 %v107_v49, %v92_v51 }
  0x90   :  { %v69_v47 = vpop.permute.xlu1 %68 }
  0x91   :  { %v87_v52 = vmul.f32 %v86_v34, %v69_v47 }
  0x92   :  { %v153_v4 = vpop.permute.xlu0 %152 }
  0x93   :  { %v91_v57 = vadd.f32 %v87_v52, %v63_v50 }
  0x95   :  { %v112_v54 = vpop.permute.xlu1 %111 }
  0x96   :  { %v121_v56 = vadd.f32 %v112_v54, %v93_v53  ;;  %v143_v10 = vpop.permute.xlu0 %142 }
  0x98   :  { %509 = vtanh.f32 %v121_v56 }
  0x99   :  { %v102_v58 = vpop.permute.xlu1 %101  ;;  %511 = vtanh.f32 %v120_v55 }
  0x9a   :  { %v119_v59 = vadd.f32 %v102_v58, %v91_v57  ;;  %v268_v24 = vpop.permute.xlu0 %267 }
  0x9b   :  { %v508_v60 = vpop.eup %507 }
  0x9c   :  { %513 = vtanh.f32 %v119_v59  ;;  %470 = vmatprep.subr.mxu0 %v508_v60 }
  0x9d   :  { %471 = vmatpush3.msra.mxu0 %v508_v60  ;;  %v148_v6 = vpop.permute.xlu1 %147 }
  0x9e   :  { %v278_v34 = vpop.permute.xlu0 %277 }
  0xa1   :  { %v138_v14 = vpop.permute.xlu1 %137 }
  0xa2   :  { %v393_v37 = vpop.permute.xlu0 %392 }
  0xa5   :  { %v510_v61 = vpop.eup %509  ;;  %v273_v23 = vpop.permute.xlu1 %272 }
  0xa6   :  { %472 = vmatprep.subr.mxu0 %v510_v61  ;;  %v512_v62 = vpop.eup %511  ;;  %v403_v45 = vpop.permute.xlu0 %402 }
  0xa7   :  { %473 = vmatpush3.msra.mxu0 %v510_v61 }
  0xa8   :  { %474 = vmatprep.subr.mxu0 %v512_v62 }
  0xa9   :  { %v514_v63 = vpop.eup %513  ;;  %475 = vmatpush3.msra.mxu0 %v512_v62  ;;  %v283_v31 = vpop.permute.xlu1 %282 }
  0xaa   :  { %476 = vmatprep.subr.mxu0 %v514_v63  ;;  %v427_v56 = vpop.permute.xlu0 %426 }
  0xab   :  { %477 = vmatpush3.msra.mxu0 %v514_v63  ;;  %v432_v58 = vrot.slane %v427_v56, %v61_v30 }
  0xac   :  { %479 = vmatmul.mubr.msk.f32.vlgmr.msra.gmra.mxu0 %vm155_vm0, %v128_v0 }
  0xad   :  { %481 = vmatprep.mubr.msk.f32.mxu0 %vm155_vm0, %v129_v1  ;;  %v398_v40 = vpop.permute.xlu1 %397 }
  0xb0   :  { %482 = vmatmul.mubr.msk.f32.gmra.mxu0 %vm155_vm0, %v130_v2 }
  0xb1   :  { %v408_v48 = vpop.permute.xlu1 %407 }
 0x16c   :  { %v480_v5 = vpop.f32.mrf.mxu0 }
 0x16d   :  { %v240_v12 = vadd.f32 %v480_v5, %v143_v10 }
 0x16e   :  { %v234_v7 = vpop.f32.mrf.mxu0 }
 0x16f   :  { %v235_v15 = vadd.f32 %v234_v7, %v138_v14 }
 0x170   :  { %v483_v8 = vpop.f32.mrf.mxu0 }
 0x171   :  { %v250_v9 = vadd.f32 %v483_v8, %v153_v4 }
 0x172   :  { %v244_v11 = vpop.f32.mrf.mxu0 }
 0x173   :  { %515 = vtanh.f32 %v250_v9  ;;  %v245_v13 = vadd.f32 %v244_v11, %v148_v6 }
 0x175   :  { %517 = vtanh.f32 %v245_v13 }
 0x176   :  { %519 = vtanh.f32 %v240_v12 }
 0x177   :  { %521 = vtanh.f32 %v235_v15 }
 0x180   :  { %v516_v16 = vpop.eup %515 }
 0x181   :  { %484 = vmatprep.subr.mxu1 %v516_v16 }
 0x182   :  { %v518_v17 = vpop.eup %517  ;;  %485 = vmatpush3.msra.mxu1 %v516_v16 }
 0x183   :  { %486 = vmatprep.subr.mxu1 %v518_v17  ;;  %v520_v18 = vpop.eup %519 }
 0x184   :  { %487 = vmatpush3.msra.mxu1 %v518_v17  ;;  %v522_v19 = vpop.eup %521 }
 0x185   :  { %488 = vmatprep.subr.mxu1 %v520_v18 }
 0x186   :  { %489 = vmatpush3.msra.mxu1 %v520_v18 }
 0x187   :  { %490 = vmatprep.subr.mxu1 %v522_v19 }
 0x188   :  { %491 = vmatpush3.msra.mxu1 %v522_v19 }
 0x189   :  { %493 = vmatmul.mubr.msk.f32.vlgmr.msra.gmra.mxu1 %vm155_vm0, %v258_v20 }
 0x18a   :  { %495 = vmatprep.mubr.msk.f32.mxu1 %vm155_vm0, %v259_v21 }
 0x18d   :  { %496 = vmatmul.mubr.msk.f32.gmra.mxu1 %vm155_vm0, %v260_v22 }
 0x249   :  { %v494_v25 = vpop.f32.mrf.mxu1 }
 0x24a   :  { %v369_v27 = vadd.f32 %v494_v25, %v273_v23 }
 0x24b   :  { %v363_v28 = vpop.f32.mrf.mxu1 }
 0x24c   :  { %v364_v29 = vadd.f32 %v363_v28, %v268_v24  ;;  %523 = vtanh.f32 %v369_v27 }
 0x24d   :  { %v497_v32 = vpop.f32.mrf.mxu1 }
 0x24e   :  { %525 = vtanh.f32 %v364_v29  ;;  %v379_v33 = vadd.f32 %v497_v32, %v283_v31 }
 0x24f   :  { %v373_v35 = vpop.f32.mrf.mxu1 }
 0x250   :  { %v374_v36 = vadd.f32 %v373_v35, %v278_v34  ;;  %527 = vtanh.f32 %v379_v33 }
 0x252   :  { %529 = vtanh.f32 %v374_v36 }
 0x259   :  { %v524_v38 = vpop.eup %523 }
 0x25a   :  { %v411_v43 = vmul.f32 %v524_v38, %v398_v40 }
 0x25b   :  { %v526_v39 = vpop.eup %525 }
 0x25c   :  { %v410_v41 = vmul.f32 %v526_v39, %v393_v37 }
 0x25d   :  { %v528_v42 = vpop.eup %527 }
 0x25e   :  { %v414_v46 = vadd.f32 %v411_v43, %v410_v41  ;;  %v413_v49 = vmul.f32 %v528_v42, %v408_v48 }
 0x25f   :  { %v530_v44 = vpop.eup %529 }
 0x260   :  { %v412_v47 = vmul.f32 %v530_v44, %v403_v45 }
 0x262   :  { %v415_v50 = vadd.f32 %v414_v46, %v412_v47 }
 0x264   :  { %v416_v51 = vadd.f32 %v415_v50, %v413_v49 }
 0x266   :  { %v417_v52 = vrot.slane %v416_v51, 4 }
 0x268   :  { %v418_v53 = vadd.f32 %v417_v52, %v416_v51 }
 0x26a   :  { %v419_v54 = vrot.slane %v418_v53, 2 }
 0x26c   :  { %v420_v55 = vadd.f32 %v419_v54, %v418_v53 }
 0x26e   :  { %v421_v57 = vrot.slane %v420_v55, 1 }
 0x270   :  { %v422_v59 = vadd.f32 %v421_v57, %v420_v55 }
 0x272   :  { %v433_v60 = vadd.f32 %v432_v58, %v422_v59 }
 0x274   :  { %v453_v61 = vmul.f32 -1.442695, %v433_v60 }
 0x276   :  { %531 = vpow2.f32 %v453_v61 }
 0x283   :  { %v532_v62 = vpop.eup %531 }
 0x284   :  { %v437_v63 = vadd.f32 1.0, %v532_v62 }
 0x286   :  { %533 = vrcp.f32 %v437_v63 }
 0x293   :  { %v534_v0 = vpop.eup %533 }
 0x294   :  { %440 = vst [vmem:[%s705_s9] sm:$0x1] %v534_v0 }

</bundles_post_ra>
